<compile_context>
chip_gen: v6e
topology: v6e:2x2x1
jax: 0.10.0
libtpu: 0.0.40
codegen_flags: <defaults>
</compile_context>

<pallas_src>
import functools

import jax
import jax.numpy as jnp
from jax import lax
from jax.experimental import pallas as pl
from jax.experimental.pallas import tpu as pltpu

STATE_DIM = 4     # CartPole-v1 observation_space.shape[0]
ACTION_DIM = 2    # CartPole-v1 action_space.n
HIDDEN = 128
LANE_CHUNK = 128  # in-kernel batch chunk (keeps live vregs small)

assert ACTION_DIM == 2, "kernel specializes the softmax for the 2-action case"


def _round_up(n, m):
    return ((n + m - 1) // m) * m


def _cdiv(a, b):
    return (a + b - 1) // b


def actor_kernel(x_ref, w1_ref, b1_ref, w2_ref, b2_ref, out_ref):
    """One batch tile, batch on the lane axis.
       x_ref  : [STATE_DIM, TB]       transposed inputs
       w1_ref : [HIDDEN, STATE_DIM]   (PyTorch Linear weight layout)
       b1_ref : [HIDDEN, 1]
       w2_ref : [HIDDEN, ACTION_DIM]  (transpose of PyTorch layout)
       b2_ref : [ACTION_DIM, 1]
       out_ref: [ACTION_DIM, TB]      transposed probabilities
    """
    tb = x_ref.shape[1]
    n_chunks = tb // LANE_CHUNK

    # Hoist weights / derived quantities out of the per-chunk loop.
    w1 = w1_ref[...]                                  # [128, 4]
    b1 = b1_ref[...]                                  # [128, 1]
    w2 = w2_ref[...]                                  # [128, 2]
    b2 = b2_ref[...]                                  # [2, 1]
    wd = w2[:, 1:2] - w2[:, 0:1]                      # [128, 1]
    db = b2[1:2, :] - b2[0:1, :]                      # [1, 1]

    def chunk(c, carry):
        off = pl.multiple_of(c * LANE_CHUNK, LANE_CHUNK)
        xc = x_ref[:, pl.ds(off, LANE_CHUNK)]         # [4, CHUNK]

        # ---- Layer 1: Linear(4 -> 128) + ReLU as unrolled VPU broadcast-FMAs.
        h = w1[:, 0:1] * xc[0:1, :]                   # [128, CHUNK]
        for k in range(1, STATE_DIM):                 # static unroll (STATE_DIM = 4)
            h = h + w1[:, k:k + 1] * xc[k:k + 1, :]
        h = jnp.maximum(h + b1, 0.0)                  # [128, CHUNK], 16 vregs live

        # ---- Layer 2 + 2-class softmax:
        #   d = logit1 - logit0; softmax = [1/(1+exp(d)), 1 - that]  (exact sum-to-1)
        # (Optionally this reduction could go to the idle MXU via
        #  jnp.dot(wd.T, h); kept on VPU/XLU — confirmed cheap at this size.)
        d = jnp.sum(wd * h, axis=0, keepdims=True) + db   # [1, CHUNK]
        e = jnp.exp(d)                                    # single exp per element
        p0 = 1.0 / (1.0 + e)
        p1 = 1.0 - p0
        # One lane-dense store for both action probabilities.
        out_ref[:, pl.ds(off, LANE_CHUNK)] = jnp.concatenate([p0, p1], axis=0)
        return carry

    lax.fori_loop(0, n_chunks, chunk, 0, unroll=True)


def _plan_tiles(batch, block_b):
    """Pick (tile_lanes, grid_steps, padded_batch).

    Pads only to 128-lane granularity (plus at most one extra chunk so the tile
    divides the padded batch), and forces >= 2 grid steps when possible so the
    batch axis can shard across both TensorCores on v7x."""
    b128 = _round_up(max(batch, 1), 128)
    chunks = b128 // 128
    max_tb_chunks = max(block_b // 128, 1)
    min_steps = 2 if chunks >= 2 else 1
    steps = max(min_steps, _cdiv(chunks, max_tb_chunks))
    tb_chunks = _cdiv(chunks, steps)
    steps = _cdiv(chunks, tb_chunks)
    tb = tb_chunks * 128
    return tb, steps, tb * steps


def _actor_probs_t(x_t, w1, b1, w2, b2, block_b):
    """Core: x_t [STATE_DIM, B] (f32) -> probsT [ACTION_DIM, B]."""
    batch = x_t.shape[1]
    tb, steps, b_pad = _plan_tiles(batch, block_b)
    if b_pad != batch:
        x_t = jnp.pad(x_t, ((0, 0), (0, b_pad - batch)))   # zero-pad -> finite epilogue

    cost = pl.CostEstimate(
        flops=b_pad * (2 * STATE_DIM * HIDDEN + 4 * HIDDEN + 8),
        transcendentals=b_pad,
        bytes_accessed=4 * (x_t.size + w1.size + b1.size + w2.size + b2.size
                            + ACTION_DIM * b_pad),
    )

    probs_t = pl.pallas_call(
        actor_kernel,
        out_shape=jax.ShapeDtypeStruct((ACTION_DIM, b_pad), jnp.float32),
        grid=(steps,),
        in_specs=[
            pl.BlockSpec((STATE_DIM, tb), lambda i: (0, i)),
            # Weights/biases: constant index_map -> VMEM-resident across grid steps.
            pl.BlockSpec((HIDDEN, STATE_DIM), lambda i: (0, 0)),
            pl.BlockSpec((HIDDEN, 1), lambda i: (0, 0)),
            pl.BlockSpec((HIDDEN, ACTION_DIM), lambda i: (0, 0)),
            pl.BlockSpec((ACTION_DIM, 1), lambda i: (0, 0)),
        ],
        out_specs=pl.BlockSpec((ACTION_DIM, tb), lambda i: (0, i)),
        compiler_params=pltpu.CompilerParams(dimension_semantics=("parallel",)),
        cost_estimate=cost,
    )(x_t, w1, b1, w2, b2)

    return probs_t[:, :batch]


@functools.partial(jax.jit, static_argnames=("block_b",))
def actor_forward_t(x_t, w1, b1, w2, b2, block_b=1024):
    """Transposed API (no wrapper transposes): x_t [STATE_DIM, B] -> [ACTION_DIM, B]."""
    return _actor_probs_t(x_t.astype(jnp.float32), w1, b1, w2, b2, block_b)


@functools.partial(jax.jit, static_argnames=("block_b",))
def actor_forward(x, w1, b1, w2, b2, block_b=1024):
    """Drop-in PyTorch semantics: x [B, STATE_DIM] -> softmax probs [B, ACTION_DIM]."""
    probs_t = _actor_probs_t(x.astype(jnp.float32).T, w1, b1, w2, b2, block_b)
    return probs_t.T


def init_params(key):
    """PyTorch nn.Linear default init (U(-1/sqrt(fan_in), +1/sqrt(fan_in))),
    stored in the layouts the kernel expects."""
    k1, k2, k3, k4 = jax.random.split(key, 4)
    bound1 = 1.0 / jnp.sqrt(STATE_DIM)
    bound2 = 1.0 / jnp.sqrt(HIDDEN)
    w1 = jax.random.uniform(k1, (HIDDEN, STATE_DIM), jnp.float32, -bound1, bound1)
    b1 = jax.random.uniform(k2, (HIDDEN, 1), jnp.float32, -bound1, bound1)
    w2 = jax.random.uniform(k3, (HIDDEN, ACTION_DIM), jnp.float32, -bound2, bound2)
    b2 = jax.random.uniform(k4, (ACTION_DIM, 1), jnp.float32, -bound2, bound2)
    return w1, b1, w2, b2


def actor_reference(x, w1, b1, w2, b2):
    # Plain-JAX reference with full-f32 matmuls (matches PyTorch float32 math).
    hp = jax.lax.Precision.HIGHEST
    h = jnp.maximum(jnp.dot(x, w1.T, precision=hp) + b1[:, 0], 0.0)
    logits = jnp.dot(h, w2, precision=hp) + b2[:, 0]
    return jax.nn.softmax(logits, axis=-1)


if __name__ == "__main__":
    key = jax.random.PRNGKey(0)
    pkey, xkey1, xkey2 = jax.random.split(key, 3)
    w1, b1, w2, b2 = init_params(pkey)

    # Small batch (single-tile path).
    x_small = jax.random.normal(xkey1, (8, STATE_DIM), jnp.float32)
    out_small = jax.block_until_ready(actor_forward(x_small, w1, b1, w2, b2))
    ref_small = actor_reference(x_small, w1, b1, w2, b2)
    assert out_small.shape == (8, ACTION_DIM)
    assert jnp.allclose(out_small, ref_small, atol=5e-5, rtol=5e-5)
    assert jnp.allclose(jnp.sum(out_small, axis=-1), 1.0, atol=1e-5)

    # Larger ragged batch (multi-tile grid + lane-padding + in-kernel chunk loop).
    x_big = jax.random.normal(xkey2, (700, STATE_DIM), jnp.float32)
    out_big = jax.block_until_ready(actor_forward(x_big, w1, b1, w2, b2))
    ref_big = actor_reference(x_big, w1, b1, w2, b2)
    assert out_big.shape == (700, ACTION_DIM)
    assert jnp.allclose(out_big, ref_big, atol=5e-5, rtol=5e-5)
    assert jnp.allclose(jnp.sum(out_big, axis=-1), 1.0, atol=1e-5)

    # Transposed (fusion-friendly) entry point: no wrapper transposes.
    out_t = jax.block_until_ready(actor_forward_t(x_big.T, w1, b1, w2, b2))
    assert out_t.shape == (ACTION_DIM, 700)
    assert jnp.allclose(out_t.T, ref_big, atol=5e-5, rtol=5e-5)

    print("KERNEL_OK")
</pallas_src>

<mosaic_0001>
module attributes {stable_mosaic.version = 11 : i64} {
  func.func @actor_kernel(%arg0: i32, %arg1: memref<4x128xf32, #tpu.memory_space<vmem>>, %arg2: memref<128x4xf32, #tpu.memory_space<vmem>>, %arg3: memref<128x1xf32, #tpu.memory_space<vmem>>, %arg4: memref<128x2xf32, #tpu.memory_space<vmem>>, %arg5: memref<2x1xf32, #tpu.memory_space<vmem>>, %arg6: memref<2x128xf32, #tpu.memory_space<vmem>>) attributes {dimension_semantics = [#tpu.dimension_semantics<parallel>], iteration_bounds = array<i64: 1>, scalar_prefetch = 0 : i64, scratch_operands = 0 : i64, tpu.core_type = #tpu.core_type<tc>, window_params = [{transform_indices = @transform_0, window_bounds = array<i64: 4, 128>}, {pipeline_mode = #tpu.pipeline_mode<synchronous>, transform_indices = @transform_1, window_bounds = array<i64: 128, 4>}, {pipeline_mode = #tpu.pipeline_mode<synchronous>, transform_indices = @transform_2, window_bounds = array<i64: 128, 1>}, {pipeline_mode = #tpu.pipeline_mode<synchronous>, transform_indices = @transform_3, window_bounds = array<i64: 128, 2>}, {pipeline_mode = #tpu.pipeline_mode<synchronous>, transform_indices = @transform_4, window_bounds = array<i64: 2, 1>}, {transform_indices = @transform_5, window_bounds = array<i64: 2, 128>}]} {
    %c0 = arith.constant 0 : index
    %c0_0 = arith.constant 0 : index
    %0 = vector.load %arg2[%c0, %c0_0] : memref<128x4xf32, #tpu.memory_space<vmem>>, vector<128x4xf32>
    %c0_1 = arith.constant 0 : index
    %c0_2 = arith.constant 0 : index
    %1 = vector.load %arg3[%c0_1, %c0_2] : memref<128x1xf32, #tpu.memory_space<vmem>>, vector<128x1xf32>
    %c0_3 = arith.constant 0 : index
    %c0_4 = arith.constant 0 : index
    %2 = vector.load %arg4[%c0_3, %c0_4] : memref<128x2xf32, #tpu.memory_space<vmem>>, vector<128x2xf32>
    %c0_5 = arith.constant 0 : index
    %c0_6 = arith.constant 0 : index
    %3 = vector.load %arg5[%c0_5, %c0_6] : memref<2x1xf32, #tpu.memory_space<vmem>>, vector<2x1xf32>
    %4 = vector.extract_strided_slice %2 {offsets = [0, 1], sizes = [128, 1], strides = [1, 1]} : vector<128x2xf32> to vector<128x1xf32>
    %5 = vector.extract_strided_slice %2 {offsets = [0, 0], sizes = [128, 1], strides = [1, 1]} : vector<128x2xf32> to vector<128x1xf32>
    %6 = arith.subf %4, %5 : vector<128x1xf32>
    %7 = vector.extract_strided_slice %3 {offsets = [1, 0], sizes = [1, 1], strides = [1, 1]} : vector<2x1xf32> to vector<1x1xf32>
    %8 = vector.extract_strided_slice %3 {offsets = [0, 0], sizes = [1, 1], strides = [1, 1]} : vector<2x1xf32> to vector<1x1xf32>
    %9 = arith.subf %7, %8 : vector<1x1xf32>
    %c0_i32 = arith.constant 0 : i32
    %c128_i32 = arith.constant 128 : i32
    %10 = arith.muli %c0_i32, %c128_i32 : i32
    %11 = tpu.assume_multiple %10, 128 : i32
    %c0_7 = arith.constant 0 : index
    %12 = arith.index_cast %11 : i32 to index
    %13 = vector.load %arg1[%c0_7, %12] : memref<4x128xf32, #tpu.memory_space<vmem>>, vector<4x128xf32>
    %14 = vector.extract_strided_slice %0 {offsets = [0, 0], sizes = [128, 1], strides = [1, 1]} : vector<128x4xf32> to vector<128x1xf32>
    %15 = vector.extract_strided_slice %13 {offsets = [0, 0], sizes = [1, 128], strides = [1, 1]} : vector<4x128xf32> to vector<1x128xf32>
    %16 = vector.broadcast %14 : vector<128x1xf32> to vector<128x128xf32>
    %17 = vector.broadcast %15 : vector<1x128xf32> to vector<128x128xf32>
    %18 = arith.mulf %16, %17 : vector<128x128xf32>
    %19 = vector.extract_strided_slice %0 {offsets = [0, 1], sizes = [128, 1], strides = [1, 1]} : vector<128x4xf32> to vector<128x1xf32>
    %20 = vector.extract_strided_slice %13 {offsets = [1, 0], sizes = [1, 128], strides = [1, 1]} : vector<4x128xf32> to vector<1x128xf32>
    %21 = vector.broadcast %19 : vector<128x1xf32> to vector<128x128xf32>
    %22 = vector.broadcast %20 : vector<1x128xf32> to vector<128x128xf32>
    %23 = arith.mulf %21, %22 : vector<128x128xf32>
    %24 = arith.addf %18, %23 : vector<128x128xf32>
    %25 = vector.extract_strided_slice %0 {offsets = [0, 2], sizes = [128, 1], strides = [1, 1]} : vector<128x4xf32> to vector<128x1xf32>
    %26 = vector.extract_strided_slice %13 {offsets = [2, 0], sizes = [1, 128], strides = [1, 1]} : vector<4x128xf32> to vector<1x128xf32>
    %27 = vector.broadcast %25 : vector<128x1xf32> to vector<128x128xf32>
    %28 = vector.broadcast %26 : vector<1x128xf32> to vector<128x128xf32>
    %29 = arith.mulf %27, %28 : vector<128x128xf32>
    %30 = arith.addf %24, %29 : vector<128x128xf32>
    %31 = vector.extract_strided_slice %0 {offsets = [0, 3], sizes = [128, 1], strides = [1, 1]} : vector<128x4xf32> to vector<128x1xf32>
    %32 = vector.extract_strided_slice %13 {offsets = [3, 0], sizes = [1, 128], strides = [1, 1]} : vector<4x128xf32> to vector<1x128xf32>
    %33 = vector.broadcast %31 : vector<128x1xf32> to vector<128x128xf32>
    %34 = vector.broadcast %32 : vector<1x128xf32> to vector<128x128xf32>
    %35 = arith.mulf %33, %34 : vector<128x128xf32>
    %36 = arith.addf %30, %35 : vector<128x128xf32>
    %37 = vector.broadcast %1 : vector<128x1xf32> to vector<128x128xf32>
    %38 = arith.addf %36, %37 : vector<128x128xf32>
    %cst = arith.constant 0.000000e+00 : f32
    %39 = vector.broadcast %cst : f32 to vector<128x128xf32>
    %40 = arith.maximumf %38, %39 : vector<128x128xf32>
    %41 = vector.broadcast %6 : vector<128x1xf32> to vector<128x128xf32>
    %42 = arith.mulf %41, %40 : vector<128x128xf32>
    %cst_8 = arith.constant dense<0.000000e+00> : vector<128xf32>
    %43 = vector.multi_reduction <add>, %42, %cst_8 [0] : vector<128x128xf32> to vector<128xf32>
    %44 = vector.shape_cast %43 : vector<128xf32> to vector<1x128xf32>
    %45 = vector.broadcast %9 : vector<1x1xf32> to vector<1x128xf32>
    %46 = arith.addf %44, %45 : vector<1x128xf32>
    %47 = math.exp %46 : vector<1x128xf32>
    %cst_9 = arith.constant 1.000000e+00 : f32
    %48 = vector.broadcast %cst_9 : f32 to vector<1x128xf32>
    %49 = arith.addf %48, %47 : vector<1x128xf32>
    %cst_10 = arith.constant 1.000000e+00 : f32
    %50 = vector.broadcast %cst_10 : f32 to vector<1x128xf32>
    %51 = arith.divf %50, %49 : vector<1x128xf32>
    %cst_11 = arith.constant 1.000000e+00 : f32
    %52 = vector.broadcast %cst_11 : f32 to vector<1x128xf32>
    %53 = arith.subf %52, %51 : vector<1x128xf32>
    %54 = tpu.concatenate %51, %53 in 0 : vector<1x128xf32>, vector<1x128xf32> -> vector<2x128xf32>
    %c0_12 = arith.constant 0 : index
    %55 = arith.index_cast %11 : i32 to index
    %56 = vector.load %arg6[%c0_12, %55] : memref<2x128xf32, #tpu.memory_space<vmem>>, vector<2x128xf32>
    tpu.vector_store %arg6[%c0_12, %55], %54 {strides = array<i32>} : memref<2x128xf32, #tpu.memory_space<vmem>>, vector<2x128xf32>,
    %c1_i32 = arith.constant 1 : i32
    return
  }
  func.func @transform_0(%arg0: i32) -> (i32, i32) {
    %c0_i32 = arith.constant 0 : i32
    %c0_i32_0 = arith.constant 0 : i32
    return %c0_i32, %arg0 : i32, i32
  }
  func.func @transform_1(%arg0: i32) -> (i32, i32) {
    %c0_i32 = arith.constant 0 : i32
    %c0_i32_0 = arith.constant 0 : i32
    %c0_i32_1 = arith.constant 0 : i32
    return %c0_i32, %c0_i32_0 : i32, i32
  }
  func.func @transform_2(%arg0: i32) -> (i32, i32) {
    %c0_i32 = arith.constant 0 : i32
    %c0_i32_0 = arith.constant 0 : i32
    %c0_i32_1 = arith.constant 0 : i32
    return %c0_i32, %c0_i32_0 : i32, i32
  }
  func.func @transform_3(%arg0: i32) -> (i32, i32) {
    %c0_i32 = arith.constant 0 : i32
    %c0_i32_0 = arith.constant 0 : i32
    %c0_i32_1 = arith.constant 0 : i32
    return %c0_i32, %c0_i32_0 : i32, i32
  }
  func.func @transform_4(%arg0: i32) -> (i32, i32) {
    %c0_i32 = arith.constant 0 : i32
    %c0_i32_0 = arith.constant 0 : i32
    %c0_i32_1 = arith.constant 0 : i32
    return %c0_i32, %c0_i32_0 : i32, i32
  }
  func.func @transform_5(%arg0: i32) -> (i32, i32) {
    %c0_i32 = arith.constant 0 : i32
    %c0_i32_0 = arith.constant 0 : i32
    return %c0_i32, %arg0 : i32, i32
  }
}

</mosaic_0001>

<bundles_post_ra>
// kernel: actor_forward.1
= control target key start
LH: loop header
LB: loop body
LE: loop exit
PB: predicated region body
PF: predicated region fallthrough
CT: control target
= control target key end

     0   :  { %v841_v2 = vmov 2   ;;  %v842_v3 = vmov 0   ;;  %s843_s22 = smov 1   ;;  %v844_v34 = vmov 1   ;;  %v845_v49 = vmov 3   ;;  %s1505_s3 = inlined_call_operand.vmem [shape: f32[128,2], index: 3, kind: input, shape index: {}]   ;;  %s1506_s1 = inlined_call_operand.vmem [shape: f32[128,4], index: 1, kind: input, shape index: {}]   ;;  %s1507_s2 = inlined_call_operand.vmem [shape: f32[128,1], index: 2, kind: input, shape index: {}]   ;;  %s1508_s0 = inlined_call_operand.vmem [shape: f32[4,128], index: 0, kind: input, shape index: {}]   ;;  %s1509_s4 = inlined_call_operand.vmem [shape: f32[2,1], index: 4, kind: input, shape index: {}]   ;;  %s1510_s5 = inlined_call_operand.vmem [shape: f32[2,128], index: 5, kind: output, shape index: {}]  }
   0x1   :  { %v879_v0 = vld [vmem:[%s1505_s3 + $0x10] sm:$0xff]  ;;  %v884_v1 = vld [vmem:[%s1505_s3] sm:$0xff]  ;;  %812 = vset.pattern.permute.xlu0 %v841_v2  ;;  %810 = vset.pattern.permute.xlu1 %v842_v3  ;;  %v895_v4 = vld [vmem:[%s1505_s3 + $0x18] sm:$0xff]  ;;  %vm798_vm0 = vcmask 1040384  }
   0x2   :  { %89 = vrot.lane.b32.xlu1 %v879_v0, %s843_s22  ;;  %85 = vrot.lane.b32.xlu0 %v884_v1, %s843_s22  ;;  %v900_v5 = vld [vmem:[%s1505_s3 + $0x8] sm:$0xff]  ;;  %v914_v7 = vld [vmem:[%s1505_s3 + $0x20] sm:$0xff] }
   0x3   :  { %v909_v6 = vld [vmem:[%s1505_s3 + $0x28] sm:$0xff]  ;;  %v923_v8 = vld [vmem:[%s1505_s3 + $0x38] sm:$0xff]  ;;  %v928_v9 = vld [vmem:[%s1505_s3 + $0x30] sm:$0xff] }
   0x4   :  { %v937_v10 = vld [vmem:[%s1505_s3 + $0x48] sm:$0xff]  ;;  %v942_v11 = vld [vmem:[%s1505_s3 + $0x40] sm:$0xff]  ;;  %v951_v12 = vld [vmem:[%s1505_s3 + $0x58] sm:$0xff] }
   0x5   :  { %v956_v13 = vld [vmem:[%s1505_s3 + $0x50] sm:$0xff]  ;;  %v965_v14 = vld [vmem:[%s1505_s3 + $0x68] sm:$0xff]  ;;  %v970_v15 = vld [vmem:[%s1505_s3 + $0x60] sm:$0xff] }
   0x6   :  { %91 = vrot.lane.b32.xlu1 %v895_v4, %s843_s22  ;;  %87 = vrot.lane.b32.xlu0 %v900_v5, %s843_s22  ;;  %v979_v16 = vld [vmem:[%s1505_s3 + $0x78] sm:$0xff]  ;;  %v984_v17 = vld [vmem:[%s1505_s3 + $0x70] sm:$0xff] }
   0x7   :  { %v993_v18 = vld [vmem:[%s1506_s1 + $0x8] sm:$0xff]  ;;  %v998_v19 = vld [vmem:[%s1506_s1] sm:$0xff]  ;;  %v1005_v20 = vld [vmem:[%s1506_s1 + $0x10] sm:$0xff] }
   0x8   :  { %v1010_v21 = vld [vmem:[%s1506_s1 + $0x18] sm:$0xff]  ;;  %v1017_v22 = vld [vmem:[%s1506_s1 + $0x20] sm:$0xff]  ;;  %v1022_v23 = vld [vmem:[%s1506_s1 + $0x28] sm:$0xff] }
   0x9   :  { %v1029_v24 = vld [vmem:[%s1506_s1 + $0x30] sm:$0xff]  ;;  %v1034_v25 = vld [vmem:[%s1506_s1 + $0x38] sm:$0xff]  ;;  %v1041_v26 = vld [vmem:[%s1506_s1 + $0x40] sm:$0xff] }
   0xa   :  { %95 = vrot.lane.b32.xlu1 %v909_v6, %s843_s22  ;;  %93 = vrot.lane.b32.xlu0 %v914_v7, %s843_s22  ;;  %v1046_v27 = vld [vmem:[%s1506_s1 + $0x48] sm:$0xff]  ;;  %v1053_v28 = vld [vmem:[%s1506_s1 + $0x50] sm:$0xff] }
   0xb   :  { %v1058_v29 = vld [vmem:[%s1506_s1 + $0x58] sm:$0xff]  ;;  %v1065_v30 = vld [vmem:[%s1506_s1 + $0x60] sm:$0xff]  ;;  %v1070_v31 = vld [vmem:[%s1506_s1 + $0x68] sm:$0xff] }
   0xc   :  { %v1077_v32 = vld [vmem:[%s1506_s1 + $0x70] sm:$0xff]  ;;  %v1082_v33 = vld [vmem:[%s1506_s1 + $0x78] sm:$0xff]  ;;  %v37_v60 = vld [vmem:[%s1507_s2 + $0x8] sm:$0xff] }
   0xd   :  { %v38_v63 = vld [vmem:[%s1507_s2 + $0x10] sm:$0xff] }
   0xe   :  { %99 = vrot.lane.b32.xlu1 %v923_v8, %s843_s22  ;;  %97 = vrot.lane.b32.xlu0 %v928_v9, %s843_s22 }
  0x12   :  { %103 = vrot.lane.b32.xlu1 %v937_v10, %s843_s22  ;;  %101 = vrot.lane.b32.xlu0 %v942_v11, %s843_s22 }
  0x16   :  { %107 = vrot.lane.b32.xlu1 %v951_v12, %s843_s22  ;;  %105 = vrot.lane.b32.xlu0 %v956_v13, %s843_s22 }
  0x1a   :  { %111 = vrot.lane.b32.xlu1 %v965_v14, %s843_s22  ;;  %109 = vrot.lane.b32.xlu0 %v970_v15, %s843_s22 }
  0x1e   :  { %115 = vrot.lane.b32.xlu1 %v979_v16, %s843_s22  ;;  %113 = vrot.lane.b32.xlu0 %v984_v17, %s843_s22 }
  0x22   :  { %161 = vperm.xlu1 %810, %v993_v18   ;;  %355 = vperm.xlu0 %812, %v998_v19  }
  0x26   :  { %166 = vperm.xlu1 %810, %v1005_v20   ;;  %367 = vperm.xlu0 %812, %v1010_v21  }
  0x2a   :  { %176 = vperm.xlu1 %810, %v1017_v22   ;;  %375 = vperm.xlu0 %812, %v1022_v23  }
  0x2e   :  { %186 = vperm.xlu1 %810, %v1029_v24   ;;  %383 = vperm.xlu0 %812, %v1034_v25  }
  0x32   :  { %196 = vperm.xlu1 %810, %v1041_v26   ;;  %391 = vperm.xlu0 %812, %v1046_v27  }
  0x36   :  { %206 = vperm.xlu1 %810, %v1053_v28   ;;  %399 = vperm.xlu0 %812, %v1058_v29  }
  0x3a   :  { %216 = vperm.xlu1 %810, %v1065_v30   ;;  %407 = vperm.xlu0 %812, %v1070_v31  }
  0x3e   :  { %226 = vperm.xlu1 %810, %v1077_v32   ;;  %415 = vperm.xlu0 %812, %v1082_v33  }
  0x42   :  { %811 = vset.pattern.permute.xlu1 %v844_v34  ;;  %814 = vset.pattern.permute.xlu0 %v844_v34 }
  0x43   :  { %259 = vperm.xlu0 %814, %v993_v18   ;;  %255 = vperm.xlu1 %811, %v998_v19  }
  0x47   :  { %271 = vperm.xlu0 %814, %v1017_v22   ;;  %263 = vperm.xlu1 %811, %v1005_v20  }
  0x4b   :  { %279 = vperm.xlu0 %814, %v1029_v24   ;;  %267 = vperm.xlu1 %811, %v1010_v21  }
  0x4f   :  { %287 = vperm.xlu0 %814, %v1041_v26   ;;  %275 = vperm.xlu1 %811, %v1022_v23  }
  0x53   :  { %295 = vperm.xlu0 %814, %v1053_v28   ;;  %283 = vperm.xlu1 %811, %v1034_v25  }
  0x57   :  { %303 = vperm.xlu0 %814, %v1065_v30   ;;  %291 = vperm.xlu1 %811, %v1046_v27  }
  0x5b   :  { %311 = vperm.xlu0 %814, %v1077_v32   ;;  %299 = vperm.xlu1 %811, %v1058_v29  }
  0x5f   :  { %307 = vperm.xlu1 %811, %v1070_v31  }
  0x63   :  { %315 = vperm.xlu1 %811, %v1082_v33  }
  0x67   :  { %813 = vset.pattern.permute.xlu1 %v841_v2 }
  0x68   :  { %359 = vperm.xlu1 %813, %v993_v18  }
  0x6c   :  { %363 = vperm.xlu1 %813, %v1005_v20  }
  0x70   :  { %371 = vperm.xlu1 %813, %v1017_v22  }
  0x74   :  { %v1108_v35 = vpop.permute.xlu1 %89  ;;  %v1110_v36 = vpop.permute.xlu0 %85  ;;  %379 = vperm.xlu1 %813, %v1029_v24  }
  0x78   :  { %v1113_v37 = vpop.permute.xlu1 %91  ;;  %v88_v38 = vpop.permute.xlu0 %87  ;;  %387 = vperm.xlu1 %813, %v1041_v26  }
  0x79   :  { %v134_v39 = vsub.f32 %v900_v5, %v88_v38  ;;  %v39_v38 = vld [vmem:[%s1507_s2 + $0x18] sm:$0xff] }
  0x7b   :  { %673 = vperm.xlu0 %814, %v134_v39  }
  0x7c   :  { %v1117_v40 = vpop.permute.xlu1 %95  ;;  %v94_v41 = vpop.permute.xlu0 %93  ;;  %395 = vperm.xlu1 %813, %v1053_v28  }
  0x7d   :  { %v137_v42 = vsub.f32 %v914_v7, %v94_v41  ;;  %v133_v7 = vsub.f32 %v884_v1, %v1110_v36  ;;  %v234_v36 = vlaneseq  ;;  %v138_v39 = vsub.f32 %v909_v6, %v1117_v40  ;;  %v1256_v40 = vld [vmem:[%s1508_s0] sm:$0xf] }
  0x7f   :  { %688 = vperm.xlu0 %814, %v137_v42   ;;  %v1239_v41 = vshrl.u32 %v234_v36, 7 }
  0x80   :  { %v100_v43 = vpop.permute.xlu1 %99  ;;  %v1121_v44 = vpop.permute.xlu0 %97  ;;  %403 = vperm.xlu1 %813, %v1065_v30  }
  0x81   :  { %v140_v45 = vsub.f32 %v923_v8, %v100_v43  ;;  %v320_v6 = vsub.s32 1, %v1239_v41 }
  0x83   :  { %703 = vperm.xlu0 %814, %v140_v45   ;;  %v41_v45 = vld [vmem:[%s1507_s2 + $0x28] sm:$0xff] }
  0x84   :  { %v102_v46 = vpop.permute.xlu0 %101  ;;  %411 = vperm.xlu1 %813, %v1077_v32   ;;  %v1127_v48 = vpop.permute.xlu1 %103 }
  0x85   :  { %v141_v47 = vsub.f32 %v942_v11, %v102_v46  ;;  %v139_v46 = vsub.f32 %v928_v9, %v1121_v44  ;;  %v1269_v44 = vrot.slane %v1256_v40, %v320_v6 }
  0x87   :  { %708 = vperm.xlu0 %814, %v141_v47   ;;  %v236_v47 = vsub.s32 0, %v1239_v41 }
  0x88   :  { %815 = vset.pattern.permute.xlu1 %v845_v49  ;;  %v1132_v50 = vpop.permute.xlu0 %105  ;;  %v1135_v51 = vpop.permute.xlu1 %107 }
  0x89   :  { %455 = vperm.xlu1 %815, %v998_v19   ;;  %v1266_v9 = vrot.slane %v1256_v40, %v236_v47 }
  0x8b   :  { %825 = vset.pattern.permute.xlu0 %v845_v49 }
  0x8c   :  { %459 = vperm.xlu0 %825, %v993_v18   ;;  %v1140_v52 = vpop.permute.xlu0 %109  ;;  %v1142_v53 = vpop.permute.xlu1 %111 }
  0x8d   :  { %463 = vperm.xlu1 %815, %v1005_v20   ;;  %v40_v20 = vld [vmem:[%s1507_s2 + $0x20] sm:$0xff] }
  0x90   :  { %471 = vperm.xlu0 %825, %v1017_v22   ;;  %v1146_v54 = vpop.permute.xlu0 %113  ;;  %v1149_v55 = vpop.permute.xlu1 %115  ;;  %v135_v22 = vsub.f32 %v879_v0, %v1108_v35  ;;  %v42_v0 = vld [vmem:[%s1507_s2 + $0x30] sm:$0xff]  ;;  %v43_v35 = vld [vmem:[%s1507_s2 + $0x38] sm:$0xff] }
  0x91   :  { %467 = vperm.xlu1 %815, %v1010_v21  }
  0x94   :  { %479 = vperm.xlu0 %825, %v1029_v24  }
  0x95   :  { %475 = vperm.xlu1 %815, %v1022_v23  }
  0x98   :  { %487 = vperm.xlu0 %825, %v1041_v26  }
  0x99   :  { %483 = vperm.xlu1 %815, %v1034_v25  }
  0x9c   :  { %495 = vperm.xlu0 %825, %v1053_v28  }
  0x9d   :  { %v1153_v56 = vpop.permute.xlu1 %161  ;;  %491 = vperm.xlu1 %815, %v1046_v27   ;;  %v1156_v57 = vpop.permute.xlu0 %355 }
  0xa0   :  { %515 = vperm.xlu0 %825, %v1082_v33  }
  0xa1   :  { %v1159_v58 = vpop.permute.xlu1 %166  ;;  %499 = vperm.xlu1 %815, %v1058_v29   ;;  %v1162_v59 = vpop.permute.xlu0 %367 }
  0xa4   :  { %830 = vset.pattern.permute.xlu0 %v842_v3 }
  0xa5   :  { %v1168_v61 = vpop.permute.xlu1 %176  ;;  %156 = vperm.xlu0 %830, %v998_v19   ;;  %816 = vset.pattern.permute.xlu1 %v842_v3  ;;  %v1172_v62 = vpop.permute.xlu0 %375 }
  0xa6   :  { %561 = vperm.xlu1 %816, %v37_v60  }
  0xa9   :  { %v1177_v2 = vpop.permute.xlu1 %186  ;;  %171 = vperm.xlu0 %830, %v1010_v21   ;;  %v1180_v5 = vpop.permute.xlu0 %383 }
  0xaa   :  { %566 = vperm.xlu1 %816, %v38_v63  }
  0xad   :  { %v1184_v8 = vpop.permute.xlu1 %196  ;;  %181 = vperm.xlu0 %830, %v1022_v23   ;;  %v1187_v11 = vpop.permute.xlu0 %391 }
  0xae   :  { %817 = vset.pattern.permute.xlu1 %v844_v34 }
  0xaf   :  { %668 = vperm.xlu1 %817, %v133_v7   ;;  %v44_v7 = vld [vmem:[%s1507_s2 + $0x40] sm:$0xff] }
  0xb1   :  { %v1190_v18 = vpop.permute.xlu1 %206  ;;  %191 = vperm.xlu0 %830, %v1034_v25   ;;  %v1193_v19 = vpop.permute.xlu0 %399  ;;  %v136_v25 = vsub.f32 %v895_v4, %v1113_v37  ;;  %v36_v4 = vld [vmem:[%s1507_s2] sm:$0xff] }
  0xb3   :  { %818 = vset.pattern.permute.xlu1 %v842_v3 }
  0xb4   :  { %576 = vperm.xlu1 %818, %v40_v20   ;;  %v45_v20 = vld [vmem:[%s1507_s2 + $0x48] sm:$0xff] }
  0xb5   :  { %v217_v1 = vpop.permute.xlu1 %216  ;;  %201 = vperm.xlu0 %830, %v1046_v27   ;;  %v1200_v21 = vpop.permute.xlu0 %407 }
  0xb8   :  { %819 = vset.pattern.permute.xlu1 %v844_v34 }
  0xb9   :  { %v227_v23 = vpop.permute.xlu1 %226  ;;  %211 = vperm.xlu0 %830, %v1058_v29   ;;  %678 = vperm.xlu1 %819, %v135_v22   ;;  %v1206_v24 = vpop.permute.xlu0 %415 }
  0xbd   :  { %221 = vperm.xlu0 %830, %v1070_v31   ;;  %683 = vperm.xlu1 %819, %v136_v25  }
  0xbe   :  { %v1211_v26 = vpop.permute.xlu0 %259  ;;  %v1213_v27 = vpop.permute.xlu1 %255 }
  0xc1   :  { %231 = vperm.xlu0 %830, %v1082_v33   ;;  %820 = vset.pattern.permute.xlu1 %v842_v3 }
  0xc2   :  { %v1220_v28 = vpop.permute.xlu0 %271  ;;  %586 = vperm.xlu1 %820, %v42_v0   ;;  %v1222_v29 = vpop.permute.xlu1 %263  ;;  %v47_v0 = vld [vmem:[%s1507_s2 + $0x58] sm:$0xff] }
  0xc5   :  { %556 = vperm.xlu0 %830, %v36_v4   ;;  %v250_v4 = vmul.f32 %v1266_v9, %v217_v1 }
  0xc6   :  { %v1230_v37 = vpop.permute.xlu0 %279  ;;  %591 = vperm.xlu1 %820, %v43_v35   ;;  %v1232_v33 = vpop.permute.xlu1 %267 }
  0xc9   :  { %571 = vperm.xlu0 %830, %v39_v38  }
  0xca   :  { %v1241_v42 = vpop.permute.xlu0 %287  ;;  %821 = vset.pattern.permute.xlu1 %v844_v34  ;;  %v1244_v43 = vpop.permute.xlu1 %275 }
  0xcb   :  { %693 = vperm.xlu1 %821, %v138_v39  }
  0xcd   :  { %581 = vperm.xlu0 %830, %v41_v45   ;;  %v48_v45 = vld [vmem:[%s1507_s2 + $0x60] sm:$0xff] }
  0xce   :  { %v1258_v60 = vpop.permute.xlu0 %295  ;;  %v1260_v63 = vpop.permute.xlu1 %283 }
  0xcf   :  { %698 = vperm.xlu1 %821, %v139_v46   ;;  %v252_v46 = vmul.f32 %v1266_v9, %v227_v23  ;;  %v68_v23 = vld [vmem:[%s1509_s4] sm:$0x3] }
  0xd1   :  { %596 = vperm.xlu0 %830, %v44_v7   ;;  %v50_v7 = vld [vmem:[%s1507_s2 + $0x70] sm:$0xff] }
  0xd2   :  { %v304_v22 = vpop.permute.xlu0 %303  ;;  %v1274_v25 = vpop.permute.xlu1 %291 }
  0xd3   :  { %v334_v35 = vmul.f32 %v1269_v44, %v304_v22  ;;  %822 = vset.pattern.permute.xlu1 %v842_v3  ;;  %v420_v22 = vsub.s32 2, %v1239_v41 }
  0xd4   :  { %601 = vperm.xlu1 %822, %v45_v20   ;;  %v46_v20 = vld [vmem:[%s1507_s2 + $0x50] sm:$0xff] }
  0xd5   :  { %v1282_v36 = vadd.f32 %v334_v35, %v250_v4  ;;  %611 = vperm.xlu0 %830, %v47_v0   ;;  %v150_v0 = vrot.slane %v68_v23, 7  ;;  %v146_v4 = vsub.f32 %v965_v14, %v1142_v53  ;;  %v323_v35 = vmul.f32 %v1269_v44, %v1211_v26 }
  0xd6   :  { %v312_v38 = vpop.permute.xlu0 %311  ;;  %v1284_v39 = vpop.permute.xlu1 %299  ;;  %v324_v14 = vmul.f32 %v1269_v44, %v1222_v29  ;;  %v142_v26 = vsub.f32 %v937_v10, %v1127_v48  ;;  %v242_v10 = vmul.f32 %v1266_v9, %v1168_v61  ;;  %v143_v61 = vsub.f32 %v956_v13, %v1132_v50  ;;  %v49_v50 = vld [vmem:[%s1507_s2 + $0x68] sm:$0xff] }
  0xd7   :  { %v336_v47 = vmul.f32 %v1269_v44, %v312_v38  ;;  %v239_v38 = vmul.f32 %v1266_v9, %v1153_v56  ;;  %v240_v56 = vmul.f32 %v1266_v9, %v1159_v58 }
  0xd8   :  { %823 = vset.pattern.permute.xlu1 %v845_v49 }
  0xd9   :  { %v1292_v1 = vadd.f32 %v336_v47, %v252_v46  ;;  %616 = vperm.xlu0 %830, %v48_v45   ;;  %503 = vperm.xlu1 %823, %v1065_v30   ;;  %v1318_v45 = vrot.slane %v1256_v40, %v420_v22  ;;  %v152_v47 = vsub.f32 %v68_v23, %v150_v0 }
  0xda   :  { %v1295_v6 = vpop.permute.xlu1 %307  ;;  %v326_v23 = vmul.f32 %v1269_v44, %v1220_v28  ;;  %v340_v29 = vadd.f32 %v324_v14, %v240_v56  ;;  %v244_v28 = vmul.f32 %v1266_v9, %v1177_v2 }
  0xdc   :  { %v342_v0 = vadd.f32 %v326_v23, %v242_v10 }
  0xdd   :  { %626 = vperm.xlu0 %830, %v50_v7   ;;  %824 = vset.pattern.permute.xlu1 %v842_v3  ;;  %v339_v7 = vadd.f32 %v323_v35, %v239_v38 }
  0xde   :  { %606 = vperm.xlu1 %824, %v46_v20   ;;  %v1308_v30 = vpop.permute.xlu1 %315 }
  0xe1   :  { %834 = vset.pattern.permute.xlu0 %v844_v34 }
  0xe2   :  { %733 = vperm.xlu0 %834, %v146_v4   ;;  %826 = vset.pattern.permute.xlu1 %v845_v49  ;;  %v328_v4 = vmul.f32 %v1269_v44, %v1230_v37 }
  0xe3   :  { %507 = vperm.xlu1 %826, %v1070_v31   ;;  %v360_v46 = vpop.permute.xlu1 %359 }
  0xe4   :  { %v423_v53 = vmul.f32 %v1318_v45, %v360_v46 }
  0xe6   :  { %v1329_v20 = vadd.f32 %v423_v53, %v339_v7  ;;  %836 = vset.pattern.permute.xlu0 %v842_v3  ;;  %v330_v7 = vmul.f32 %v1269_v44, %v1241_v42  ;;  %v332_v53 = vmul.f32 %v1269_v44, %v1258_v60  ;;  %v248_v42 = vmul.f32 %v1266_v9, %v1190_v18 }
  0xe7   :  { %827 = vset.pattern.permute.xlu1 %v844_v34  ;;  %v364_v31 = vpop.permute.xlu1 %363  ;;  %785 = vperm.xlu0 %836, %v152_v47   ;;  %v344_v47 = vadd.f32 %v328_v4, %v244_v28  ;;  %v144_v60 = vsub.f32 %v951_v12, %v1135_v51 }
  0xe8   :  { %v424_v22 = vmul.f32 %v1318_v45, %v364_v31  ;;  %713 = vperm.xlu1 %827, %v142_v26   ;;  %v348_v31 = vadd.f32 %v332_v53, %v248_v42 }
  0xea   :  { %v440_v48 = vadd.f32 %v424_v22, %v340_v29 }
  0xeb   :  { %v372_v58 = vpop.permute.xlu1 %371 }
  0xec   :  { %v426_v35 = vmul.f32 %v1318_v45, %v372_v58  ;;  %828 = vset.pattern.permute.xlu1 %v845_v49  ;;  %v145_v58 = vsub.f32 %v970_v15, %v1140_v52  ;;  %v520_v15 = vsub.s32 3, %v1239_v41 }
  0xed   :  { %511 = vperm.xlu1 %828, %v1077_v32   ;;  %v246_v32 = vmul.f32 %v1266_v9, %v1184_v8 }
  0xee   :  { %v1345_v38 = vadd.f32 %v426_v35, %v342_v0 }
  0xef   :  { %v380_v46 = vpop.permute.xlu1 %379  ;;  %v346_v14 = vadd.f32 %v330_v7, %v246_v32 }
  0xf0   :  { %v428_v37 = vmul.f32 %v1318_v45, %v380_v46  ;;  %v51_v46 = vld [vmem:[%s1507_s2 + $0x78] sm:$0xff] }
  0xf1   :  { %829 = vset.pattern.permute.xlu1 %v844_v34 }
  0xf2   :  { %v1355_v49 = vadd.f32 %v428_v37, %v344_v47  ;;  %718 = vperm.xlu1 %829, %v143_v61  }
  0xf3   :  { %v388_v2 = vpop.permute.xlu1 %387 }
  0xf4   :  { %v430_v13 = vmul.f32 %v1318_v45, %v388_v2 }
  0xf6   :  { %v1365_v26 = vadd.f32 %v430_v13, %v346_v14  ;;  %v674_v8 = vpop.permute.xlu0 %673  ;;  %831 = vset.pattern.permute.xlu1 %v842_v3 }
  0xf7   :  { %621 = vperm.xlu1 %831, %v49_v50   ;;  %v396_v56 = vpop.permute.xlu1 %395 }
  0xf8   :  { %v432_v23 = vmul.f32 %v1318_v45, %v396_v56 }
  0xfa   :  { %v1371_v29 = vadd.f32 %v432_v23, %v348_v31  ;;  %v1373_v22 = vpop.permute.xlu0 %688  ;;  %v422_v23 = vmul.f32 %v1318_v45, %v1156_v57 }
  0xfb   :  { %832 = vset.pattern.permute.xlu1 %v844_v34  ;;  %v404_v18 = vpop.permute.xlu1 %403 }
  0xfc   :  { %v434_v10 = vmul.f32 %v1318_v45, %v404_v18  ;;  %723 = vperm.xlu1 %832, %v144_v60  }
  0xfe   :  { %v1380_v0 = vadd.f32 %v434_v10, %v1282_v36  ;;  %v1382_v4 = vpop.permute.xlu0 %703  ;;  %v1396_v36 = vrot.slane %v1256_v40, %v520_v15  ;;  %v425_v15 = vmul.f32 %v1318_v45, %v1162_v59 }
  0xff   :  { %v412_v35 = vpop.permute.xlu1 %411 }
 0x100   :  { %v436_v12 = vmul.f32 %v1318_v45, %v412_v35  ;;  %728 = vperm.xlu1 %832, %v145_v58   ;;  %v325_v58 = vmul.f32 %v1269_v44, %v1232_v33 }
 0x102   :  { %v1386_v51 = vadd.f32 %v436_v12, %v1292_v1  ;;  %v1388_v28 = vpop.permute.xlu0 %708  ;;  %v147_v1 = vsub.f32 %v984_v17, %v1146_v54 }
 0x104   :  { %833 = vset.pattern.permute.xlu1 %v842_v3  ;;  %v456_v52 = vpop.permute.xlu1 %455  ;;  %v148_v3 = vsub.f32 %v979_v16, %v1149_v55  ;;  %v322_v55 = vmul.f32 %v1269_v44, %v1213_v27 }
 0x105   :  { %631 = vperm.xlu1 %833, %v51_v46   ;;  %v522_v35 = vmul.f32 %v1396_v36, %v456_v52 }
 0x107   :  { %v460_v61 = vpop.permute.xlu0 %459 }
 0x108   :  { %v464_v47 = vpop.permute.xlu1 %463 }
 0x109   :  { %v524_v7 = vmul.f32 %v1396_v36, %v464_v47  ;;  %835 = vset.pattern.permute.xlu1 %v844_v34  ;;  %v523_v34 = vmul.f32 %v1396_v36, %v460_v61  ;;  %v327_v47 = vmul.f32 %v1269_v44, %v1244_v43 }
 0x10a   :  { %738 = vperm.xlu1 %835, %v147_v1  }
 0x10b   :  { %v472_v37 = vpop.permute.xlu0 %471  ;;  %v1402_v32 = vadd.f32 %v524_v7, %v440_v48  ;;  %v539_v16 = vadd.f32 %v523_v34, %v1329_v20 }
 0x10c   :  { %v468_v41 = vpop.permute.xlu1 %467 }
 0x10d   :  { %v525_v33 = vmul.f32 %v1396_v36, %v468_v41 }
 0x10e   :  { %743 = vperm.xlu1 %835, %v148_v3   ;;  %v526_v3 = vmul.f32 %v1396_v36, %v472_v37  ;;  %v429_v37 = vmul.f32 %v1318_v45, %v1180_v5 }
 0x10f   :  { %v1406_v40 = vpop.permute.xlu0 %479 }
 0x110   :  { %v476_v2 = vpop.permute.xlu1 %475 }
 0x113   :  { %v1408_v14 = vpop.permute.xlu0 %487 }
 0x114   :  { %v484_v17 = vpop.permute.xlu1 %483 }
 0x117   :  { %v1410_v54 = vpop.permute.xlu0 %495 }
 0x118   :  { %v492_v53 = vpop.permute.xlu1 %491 }
 0x11b   :  { %v1412_v13 = vpop.permute.xlu0 %515 }
 0x11c   :  { %v1415_v48 = vpop.permute.xlu1 %499 }
 0x120   :  { %v157_v50 = vpop.permute.xlu0 %156 }
 0x121   :  { %v238_v42 = vmul.f32 %v1266_v9, %v157_v50  ;;  %v562_v56 = vpop.permute.xlu1 %561 }
 0x122   :  { %v635_v31 = vadd.f32 %v562_v56, %v539_v16  ;;  %v542_v56 = vadd.f32 %v526_v3, %v1345_v38  ;;  %v431_v38 = vmul.f32 %v1318_v45, %v1187_v11 }
 0x123   :  { %v338_v60 = vadd.f32 %v322_v55, %v238_v42  ;;  %v329_v55 = vmul.f32 %v1269_v44, %v1260_v63  ;;  %v527_v42 = vmul.f32 %v1396_v36, %v476_v2  ;;  %v529_v63 = vmul.f32 %v1396_v36, %v484_v17 }
 0x124   :  { %v651_v18 = vmax.f32 %v635_v31, 0.0  ;;  %v172_v10 = vpop.permute.xlu0 %171 }
 0x125   :  { %v241_v20 = vmul.f32 %v1266_v9, %v172_v10  ;;  %v1427_v12 = vpop.permute.xlu1 %566  ;;  %v438_v27 = vadd.f32 %v422_v23, %v338_v60  ;;  %v331_v10 = vmul.f32 %v1269_v44, %v1274_v25  ;;  %v531_v25 = vmul.f32 %v1396_v36, %v492_v53 }
 0x126   :  { %v1429_v46 = vmul.f32 %v674_v8, %v651_v18  ;;  %v427_v8 = vmul.f32 %v1318_v45, %v1172_v62  ;;  %v435_v53 = vmul.f32 %v1318_v45, %v1200_v21  ;;  %v636_v21 = vadd.f32 %v1427_v12, %v1402_v32 }
 0x127   :  { %v341_v61 = vadd.f32 %v325_v58, %v241_v20  ;;  %v538_v57 = vadd.f32 %v522_v35, %v438_v27 }
 0x128   :  { %v182_v1 = vpop.permute.xlu0 %181 }
 0x129   :  { %v243_v52 = vmul.f32 %v1266_v9, %v182_v1  ;;  %v441_v7 = vadd.f32 %v425_v15, %v341_v61  ;;  %v333_v1 = vmul.f32 %v1269_v44, %v1284_v39 }
 0x12a   :  { %v669_v34 = vpop.permute.xlu1 %668 }
 0x12b   :  { %v343_v50 = vadd.f32 %v327_v47, %v243_v52  ;;  %v541_v16 = vadd.f32 %v525_v33, %v441_v7  ;;  %v433_v33 = vmul.f32 %v1318_v45, %v1193_v19 }
 0x12c   :  { %v192_v59 = vpop.permute.xlu0 %191 }
 0x12d   :  { %v245_v43 = vmul.f32 %v1266_v9, %v192_v59  ;;  %v443_v41 = vadd.f32 %v427_v8, %v343_v50  ;;  %v533_v8 = vmul.f32 %v1396_v36, %v1415_v48  ;;  %v437_v48 = vmul.f32 %v1318_v45, %v1206_v24 }
 0x12e   :  { %v530_v45 = vmul.f32 %v1396_v36, %v1408_v14 }
 0x12f   :  { %v345_v31 = vadd.f32 %v329_v55, %v245_v43  ;;  %v577_v23 = vpop.permute.xlu1 %576  ;;  %v543_v60 = vadd.f32 %v527_v42, %v443_v41  ;;  %v337_v42 = vmul.f32 %v1269_v44, %v1308_v30 }
 0x130   :  { %v638_v62 = vadd.f32 %v577_v23, %v542_v56  ;;  %v202_v18 = vpop.permute.xlu0 %201 }
 0x131   :  { %v247_v2 = vmul.f32 %v1266_v9, %v202_v18  ;;  %v445_v58 = vadd.f32 %v429_v37, %v345_v31  ;;  %v652_v18 = vmax.f32 %v636_v21, 0.0 }
 0x132   :  { %v654_v35 = vmax.f32 %v638_v62, 0.0 }
 0x133   :  { %v347_v20 = vadd.f32 %v331_v10, %v247_v2  ;;  %v545_v27 = vadd.f32 %v529_v63, %v445_v58 }
 0x134   :  { %v750_v5 = vmul.f32 %v1373_v22, %v654_v35  ;;  %v212_v15 = vpop.permute.xlu0 %211  ;;  %v679_v61 = vpop.permute.xlu1 %678  ;;  %v335_v22 = vmul.f32 %v1269_v44, %v1295_v6  ;;  %v528_v44 = vmul.f32 %v1396_v36, %v1406_v40 }
 0x135   :  { %v249_v17 = vmul.f32 %v1266_v9, %v212_v15  ;;  %v447_v47 = vadd.f32 %v431_v38, %v347_v20  ;;  %v748_v58 = vmul.f32 %v679_v61, %v652_v18 }
 0x136   :  { %v544_v2 = vadd.f32 %v528_v44, %v1355_v49 }
 0x137   :  { %v349_v52 = vadd.f32 %v333_v1, %v249_v17  ;;  %v547_v7 = vadd.f32 %v531_v25, %v447_v47 }
 0x138   :  { %v222_v11 = vpop.permute.xlu0 %221  ;;  %v684_v3 = vpop.permute.xlu1 %683 }
 0x139   :  { %v251_v39 = vmul.f32 %v1266_v9, %v222_v11  ;;  %v449_v50 = vadd.f32 %v433_v33, %v349_v52 }
 0x13b   :  { %v351_v59 = vadd.f32 %v335_v22, %v251_v39  ;;  %v1467_v55 = vadd.f32 %v533_v8, %v449_v50 }
 0x13c   :  { %v232_v19 = vpop.permute.xlu0 %231 }
 0x13d   :  { %v253_v43 = vmul.f32 %v1266_v9, %v232_v19  ;;  %v587_v41 = vpop.permute.xlu1 %586  ;;  %v1472_v6 = vadd.f32 %v435_v53, %v351_v59  ;;  %v532_v19 = vmul.f32 %v1396_v36, %v1410_v54 }
 0x13f   :  { %v353_v56 = vadd.f32 %v337_v42, %v253_v43 }
 0x140   :  { %v557_v37 = vpop.permute.xlu0 %556 }
 0x141   :  { %v634_v31 = vadd.f32 %v557_v37, %v538_v57  ;;  %v592_v23 = vpop.permute.xlu1 %591  ;;  %v1478_v62 = vadd.f32 %v437_v48, %v353_v56  ;;  %v640_v57 = vadd.f32 %v587_v41, %v544_v2  ;;  %v548_v41 = vadd.f32 %v532_v19, %v1371_v29 }
 0x142   :  { %v641_v38 = vadd.f32 %v592_v23, %v545_v27 }
 0x143   :  { %v650_v30 = vmax.f32 %v634_v31, 0.0  ;;  %v656_v49 = vmax.f32 %v640_v57, 0.0 }
 0x144   :  { %v572_v9 = vpop.permute.xlu0 %571  ;;  %v657_v47 = vmax.f32 %v641_v38, 0.0 }
 0x145   :  { %v746_v10 = vmul.f32 %v669_v34, %v650_v30  ;;  %v637_v63 = vadd.f32 %v572_v9, %v541_v16  ;;  %v546_v16 = vadd.f32 %v530_v45, %v1365_v26 }
 0x146   :  { %v694_v24 = vpop.permute.xlu1 %693  ;;  %v753_v27 = vmul.f32 %v1382_v4, %v657_v47 }
 0x147   :  { %v762_v32 = vadd.f32 %v1429_v46, %v746_v10  ;;  %v653_v12 = vmax.f32 %v637_v63, 0.0 }
 0x148   :  { %v582_v35 = vpop.permute.xlu0 %581 }
 0x149   :  { %v749_v20 = vmul.f32 %v684_v3, %v653_v12  ;;  %v763_v40 = vadd.f32 %v762_v32, %v748_v58  ;;  %v639_v15 = vadd.f32 %v582_v35, %v543_v60 }
 0x14a   :  { %v699_v1 = vpop.permute.xlu1 %698 }
 0x14b   :  { %v764_v25 = vadd.f32 %v763_v40, %v749_v20  ;;  %v655_v34 = vmax.f32 %v639_v15, 0.0  ;;  %v752_v52 = vmul.f32 %v699_v1, %v656_v49 }
 0x14c   :  { %v597_v17 = vpop.permute.xlu0 %596 }
 0x14d   :  { %v751_v33 = vmul.f32 %v694_v24, %v655_v34  ;;  %v765_v14 = vadd.f32 %v764_v25, %v750_v5  ;;  %v642_v61 = vadd.f32 %v597_v17, %v546_v16 }
 0x14f   :  { %v766_v46 = vadd.f32 %v765_v14, %v751_v33  ;;  %v658_v11 = vmax.f32 %v642_v61, 0.0  ;;  %v602_v22 = vpop.permute.xlu1 %601 }
 0x150   :  { %v643_v26 = vadd.f32 %v602_v22, %v547_v7  ;;  %v612_v37 = vpop.permute.xlu0 %611 }
 0x151   :  { %v767_v3 = vadd.f32 %v766_v46, %v752_v52  ;;  %v754_v60 = vmul.f32 %v1388_v28, %v658_v11  ;;  %v645_v54 = vadd.f32 %v612_v37, %v1467_v55 }
 0x152   :  { %v659_v5 = vmax.f32 %v643_v26, 0.0 }
 0x153   :  { %v768_v8 = vadd.f32 %v767_v3, %v753_v27  ;;  %v661_v10 = vmax.f32 %v645_v54, 0.0 }
 0x154   :  { %v504_v39 = vpop.permute.xlu1 %503  ;;  %v617_v30 = vpop.permute.xlu0 %616 }
 0x155   :  { %v769_v50 = vadd.f32 %v768_v8, %v754_v60  ;;  %v534_v28 = vmul.f32 %v1396_v36, %v504_v39 }
 0x157   :  { %v550_v9 = vadd.f32 %v534_v28, %v1380_v0 }
 0x158   :  { %v627_v24 = vpop.permute.xlu0 %626 }
 0x159   :  { %v607_v53 = vpop.permute.xlu1 %606  ;;  %v646_v2 = vadd.f32 %v617_v30, %v550_v9 }
 0x15a   :  { %v644_v56 = vadd.f32 %v607_v53, %v548_v41 }
 0x15b   :  { %v662_v35 = vmax.f32 %v646_v2, 0.0 }
 0x15c   :  { %v660_v21 = vmax.f32 %v644_v56, 0.0 }
 0x15d   :  { %v734_v40 = vpop.permute.xlu0 %733 }
 0x15e   :  { %v508_v59 = vpop.permute.xlu1 %507 }
 0x15f   :  { %v535_v7 = vmul.f32 %v1396_v36, %v508_v59 }
 0x161   :  { %v551_v29 = vadd.f32 %v535_v7, %v1472_v6  ;;  %v537_v6 = vmul.f32 %v1396_v36, %v1412_v13 }
 0x163   :  { %v714_v42 = vpop.permute.xlu1 %713  ;;  %v553_v16 = vadd.f32 %v537_v6, %v1478_v62 }
 0x164   :  { %v755_v43 = vmul.f32 %v714_v42, %v659_v5 }
 0x166   :  { %v770_v48 = vadd.f32 %v769_v50, %v755_v43 }
 0x168   :  { %v512_v4 = vpop.permute.xlu1 %511 }
 0x169   :  { %v536_v58 = vmul.f32 %v1396_v36, %v512_v4  ;;  %v786_v36 = vpop.permute.xlu0 %785 }
 0x16b   :  { %v552_v20 = vadd.f32 %v536_v58, %v1386_v51 }
 0x16d   :  { %v719_v31 = vpop.permute.xlu1 %718  ;;  %v648_v25 = vadd.f32 %v627_v24, %v552_v20 }
 0x16e   :  { %v756_v23 = vmul.f32 %v719_v31, %v660_v21 }
 0x16f   :  { %v664_v17 = vmax.f32 %v648_v25, 0.0 }
 0x170   :  { %v771_v44 = vadd.f32 %v770_v48, %v756_v23 }
 0x172   :  { %v622_v18 = vpop.permute.xlu1 %621 }
 0x173   :  { %v647_v63 = vadd.f32 %v622_v18, %v551_v29 }
 0x175   :  { %v663_v12 = vmax.f32 %v647_v63, 0.0 }
 0x177   :  { %v724_v45 = vpop.permute.xlu1 %723  ;;  %v759_v0 = vmul.f32 %v734_v40, %v663_v12 }
 0x178   :  { %v757_v32 = vmul.f32 %v724_v45, %v661_v10 }
 0x17a   :  { %v772_v57 = vadd.f32 %v771_v44, %v757_v32 }
 0x17b   :  { %v729_v38 = vpop.permute.xlu1 %728 }
 0x17c   :  { %v758_v55 = vmul.f32 %v729_v38, %v662_v35 }
 0x17e   :  { %v773_v15 = vadd.f32 %v772_v57, %v758_v55 }
 0x180   :  { %v632_v1 = vpop.permute.xlu1 %631  ;;  %v774_v34 = vadd.f32 %v773_v15, %v759_v0 }
 0x181   :  { %v649_v49 = vadd.f32 %v632_v1, %v553_v16 }
 0x183   :  { %v665_v14 = vmax.f32 %v649_v49, 0.0 }
 0x185   :  { %v739_v47 = vpop.permute.xlu1 %738 }
 0x186   :  { %v760_v33 = vmul.f32 %v739_v47, %v664_v17 }
 0x188   :  { %v775_v61 = vadd.f32 %v774_v34, %v760_v33 }
 0x189   :  { %v744_v52 = vpop.permute.xlu1 %743 }
 0x18a   :  { %v761_v51 = vmul.f32 %v744_v52, %v665_v14 }
 0x18c   :  { %v776_v46 = vadd.f32 %v775_v61, %v761_v51 }
 0x18e   :  { %v777_v11 = vrot.slane %v776_v46, 4 }
 0x190   :  { %v778_v22 = vadd.f32 %v777_v11, %v776_v46 }
 0x192   :  { %v779_v27 = vrot.slane %v778_v22, 2 }
 0x194   :  { %v780_v3 = vadd.f32 %v779_v27, %v778_v22 }
 0x196   :  { %v781_v8 = vrot.slane %v780_v3, 1 }
 0x198   :  { %v782_v13 = vadd.f32 %v781_v8, %v780_v3 }
 0x19a   :  { %v788_v60 = vadd.f32 %v786_v36, %v782_v13 }
 0x19c   :  { %v789_v39 = vmul.f32 1.442695, %v788_v60 }
 0x19e   :  { %837 = vpow2.f32 %v789_v39 }
 0x1ab   :  { %v838_v62 = vpop.eup %837 }
 0x1ac   :  { %v791_v50 = vadd.f32 1.0, %v838_v62 }
 0x1ae   :  { %839 = vrcp.f32 %v791_v50 }
 0x1bb   :  { %v840_v53 = vpop.eup %839 }
 0x1bc   :  { %v794_v26 = vsub.f32 1.0, %v840_v53  ;;  %v796_v59 = vrot.slane %v840_v53, 1 }
 0x1be   :  { %v799_v19 = vsel %vm798_vm0, %v796_v59, %v794_v26 }
 0x1bf   :  { %800 = vst [vmem:[%s1510_s5] sm:$0x3] %v799_v19 }

</bundles_post_ra>
